<compile_context>
chip_gen: v7x
topology: tpu7x:2x2x1
jax: 0.10.0
libtpu: 0.0.40
codegen_flags: <defaults>
</compile_context>

<pallas_src>
import functools

import jax
import jax.numpy as jnp
from jax import lax
from jax.experimental import pallas as pl
from jax.experimental.pallas import tpu as pltpu


def _round_up(n, m):
    return -(-n // m) * m


def _round_down(n, m):
    return (n // m) * m


def _cdiv(n, m):
    return -(-n // m)


def _tpu_budgets():
    """Per-generation (x-block byte budget, scoped VMEM limit)."""
    try:
        vmem_cap = pltpu.get_tpu_info().vmem_capacity_bytes
    except Exception:
        vmem_cap = 64 << 20  # query unavailable -> assume tightest (v7x-sized) VMEM
    if vmem_cap <= (64 << 20):
        # v7x: 64 MiB VMEM/TC -> ~2 MiB x blocks keep double-buffered in+out
        # blocks plus f32 temps well inside the 32 MiB scoped limit.
        return 2 << 20, 32 << 20
    # v5e / v6e: 128 MiB physical VMEM -> ~4 MiB blocks amortize the ~0.35 us
    # per-grid-step overhead a bit further; raise the scoped limit to match.
    return 4 << 20, 64 << 20


def _insnorm_kernel(x_ref, s_ref, o_ref, *, eps):
    # x_ref: (BLK_ROWS, HW)  one row per (b, c) instance
    # s_ref: (BLK_ROWS, 1)   per-row scale (channel scale tiled over batch)
    x = x_ref[...].astype(jnp.float32)
    s = s_ref[...].astype(jnp.float32)

    # Two-pass statistics (matches torch.mean + torch.var*(N-1)/N numerics).
    mean = jnp.mean(x, axis=1, keepdims=True)            # (BLK_ROWS, 1)
    xc = x - mean
    var = jnp.mean(xc * xc, axis=1, keepdims=True)       # biased / population var

    # Fused per-row affine: 1 mul + 1 add per element on the hot path.
    a = lax.rsqrt(var + eps) * s                         # (BLK_ROWS, 1)
    # NOTE: matches the PyTorch module: both the multiplier AND the additive
    # term are `scale` (the module builds `shift_broadcast` from self.scale).
    o_ref[...] = (xc * a + s).astype(o_ref.dtype)


@functools.partial(jax.jit, static_argnames=("eps",))
def insnorm(x, scale, *, eps=1e-9):
    """x: (B, C, H, W), scale: (C,). Returns (B, C, H, W)."""
    B, C, H, W = x.shape
    HW = H * W
    rows = B * C

    # (B*C, H*W): one instance per row, spatial on lanes.  Under jit these
    # reshapes / the tiny tile are fused — no extra HBM pass.
    x2 = x.reshape(rows, HW)
    s2 = jnp.tile(scale, (B,)).reshape(rows, 1)          # row (b, c) -> scale[c]

    itemsize = jnp.dtype(x.dtype).itemsize
    mult = max(8, 32 // itemsize)                        # sublane multiple
    rows_ceil = _round_up(rows, mult)

    budget_bytes, vmem_limit = _tpu_budgets()

    # Primary knob: ~budget_bytes of x per block.
    blk_rows = max(mult, _round_down(max(1, budget_bytes // (HW * itemsize)), mult))

    # VMEM safety clamp: double-buffered x/out blocks, the (blk_rows, 1) scale
    # block (lane-padded to 128 lanes -> 512 B/row in VMEM), and ~3 block-sized
    # f32 temps must fit the scoped limit with headroom.
    per_row_bytes = 4 * HW * itemsize + 2 * (128 * 4) + 3 * HW * 4
    vmem_rows = max(mult, _round_down(int(0.7 * vmem_limit) // per_row_bytes, mult))
    blk_rows = min(blk_rows, vmem_rows, rows_ceil)

    # v7x megacore: keep at least 2 grid steps so dimension_semantics=
    # ("parallel",) can split rows across the 2 TensorCores; prefer an even
    # step count so neither core carries a trailing extra iteration.
    if rows_ceil > mult:
        blk_rows = min(blk_rows, max(mult, _round_down(rows_ceil // 2, mult)))
    n_steps = _cdiv(rows_ceil, blk_rows)
    if n_steps > 1 and n_steps % 2 == 1:
        cand = max(mult, _round_up(_cdiv(rows_ceil, n_steps + 1), mult))
        if _cdiv(rows_ceil, cand) % 2 == 0:
            blk_rows = cand

    # No row padding / output slicing: cdiv grid, Pallas masks the ragged last
    # block (its garbage rows never reach HBM).  Avoids the two extra full HBM
    # passes that jnp.pad + out[:rows] cost on this bandwidth-bound op.
    grid = (_cdiv(rows, blk_rows),)

    # TODO(synk): for very large H*W (>= ~0.5M elems/row) even an 8-row block
    # plus the f32 temps exceeds the VMEM limit (v7x first); that case needs an
    # inner "arbitrary" grid axis over HW with sum/sumsq accumulators.
    # TODO(synk): if HW is not a multiple of 128 (e.g. 7x7 maps), repack so the
    # lane axis is dense (fold instances onto lanes) to avoid masked stores and
    # strided per-row DMA; same repack would make the scale input lane-dense.

    out2 = pl.pallas_call(
        functools.partial(_insnorm_kernel, eps=eps),
        out_shape=jax.ShapeDtypeStruct((rows, HW), x.dtype),
        grid_spec=pltpu.PrefetchScalarGridSpec(
            num_scalar_prefetch=0,
            grid=grid,
            in_specs=[
                pl.BlockSpec((blk_rows, HW), lambda i: (i, 0)),
                pl.BlockSpec((blk_rows, 1), lambda i: (i, 0)),
            ],
            # Output keeps full HW on the lane axis -> lane-dense unmasked stores.
            out_specs=pl.BlockSpec((blk_rows, HW), lambda i: (i, 0)),
        ),
        compiler_params=pltpu.CompilerParams(
            dimension_semantics=("parallel",),
            vmem_limit_bytes=vmem_limit,
        ),
    )(x2, s2)

    return out2.reshape(B, C, H, W)


def _reference(x, scale, eps=1e-9):
    """Pure-JAX reference mirroring the PyTorch forward (including the bug)."""
    B, C, H, W = x.shape
    flat = x.reshape(B, C, H * W).astype(jnp.float32)
    mean = jnp.mean(flat, axis=2)[:, :, None, None]
    var = jnp.var(flat, axis=2)[:, :, None, None]   # biased == torch.var*(N-1)/N
    sb = scale[None, :, None, None]
    out = (x.astype(jnp.float32) - mean) / jnp.sqrt(var + eps)
    return (out * sb + sb).astype(x.dtype)


if __name__ == "__main__":
    key = jax.random.PRNGKey(0)
    kx, ks = jax.random.split(key)

    B, C, H, W = 2, 4, 16, 16
    x = jax.random.normal(kx, (B, C, H, W), dtype=jnp.float32)
    # Deterministic stand-in for nn.Parameter(...).uniform_() (uniform in [0,1)).
    scale = jax.random.uniform(ks, (C,), dtype=jnp.float32)
    # `shift` is zero-initialized and (due to the module's bug) never used in
    # forward, so it does not appear in the kernel.

    y = insnorm(x, scale)
    jax.block_until_ready(y)

    y_ref = _reference(x, scale)
    assert jnp.allclose(y, y_ref, atol=1e-5, rtol=1e-5), "mismatch vs reference"

    print("KERNEL_OK")
</pallas_src>

<mosaic_0001>
module attributes {stable_mosaic.version = 11 : i64} {
  func.func @_insnorm_kernel(%arg0: i32, %arg1: memref<8x256xf32, #tpu.memory_space<vmem>>, %arg2: memref<8x1xf32, #tpu.memory_space<vmem>>, %arg3: memref<8x256xf32, #tpu.memory_space<vmem>>) attributes {dimension_semantics = [#tpu.dimension_semantics<parallel>], iteration_bounds = array<i64: 1>, scalar_prefetch = 0 : i64, scratch_operands = 0 : i64, tpu.core_type = #tpu.core_type<tc>, window_params = [{transform_indices = @transform_0, window_bounds = array<i64: 8, 256>}, {transform_indices = @transform_1, window_bounds = array<i64: 8, 1>}, {transform_indices = @transform_2, window_bounds = array<i64: 8, 256>}]} {
    %c0 = arith.constant 0 : index
    %c0_0 = arith.constant 0 : index
    %0 = vector.load %arg1[%c0, %c0_0] : memref<8x256xf32, #tpu.memory_space<vmem>>, vector<8x256xf32>
    %c0_1 = arith.constant 0 : index
    %c0_2 = arith.constant 0 : index
    %1 = vector.load %arg2[%c0_1, %c0_2] : memref<8x1xf32, #tpu.memory_space<vmem>>, vector<8x1xf32>
    %cst = arith.constant dense<0.000000e+00> : vector<8xf32>
    %2 = vector.multi_reduction <add>, %0, %cst [1] : vector<8x256xf32> to vector<8xf32>
    %3 = vector.shape_cast %2 : vector<8xf32> to vector<8x1xf32>
    %cst_3 = arith.constant 2.560000e+02 : f32
    %4 = vector.broadcast %cst_3 : f32 to vector<8x1xf32>
    %5 = arith.divf %3, %4 : vector<8x1xf32>
    %6 = vector.broadcast %5 : vector<8x1xf32> to vector<8x256xf32>
    %7 = arith.subf %0, %6 : vector<8x256xf32>
    %8 = arith.mulf %7, %7 : vector<8x256xf32>
    %cst_4 = arith.constant dense<0.000000e+00> : vector<8xf32>
    %9 = vector.multi_reduction <add>, %8, %cst_4 [1] : vector<8x256xf32> to vector<8xf32>
    %10 = vector.shape_cast %9 : vector<8xf32> to vector<8x1xf32>
    %cst_5 = arith.constant 2.560000e+02 : f32
    %11 = vector.broadcast %cst_5 : f32 to vector<8x1xf32>
    %12 = arith.divf %10, %11 : vector<8x1xf32>
    %cst_6 = arith.constant 9.99999971E-10 : f32
    %13 = vector.broadcast %cst_6 : f32 to vector<8x1xf32>
    %14 = arith.addf %12, %13 : vector<8x1xf32>
    %15 = math.rsqrt %14 : vector<8x1xf32>
    %16 = arith.mulf %15, %1 : vector<8x1xf32>
    %17 = vector.broadcast %16 : vector<8x1xf32> to vector<8x256xf32>
    %18 = arith.mulf %7, %17 : vector<8x256xf32>
    %19 = vector.broadcast %1 : vector<8x1xf32> to vector<8x256xf32>
    %20 = arith.addf %18, %19 : vector<8x256xf32>
    %c0_7 = arith.constant 0 : index
    %c0_8 = arith.constant 0 : index
    %21 = vector.load %arg3[%c0_7, %c0_8] : memref<8x256xf32, #tpu.memory_space<vmem>>, vector<8x256xf32>
    tpu.vector_store %arg3[%c0_7, %c0_8], %20 {strides = array<i32>} : memref<8x256xf32, #tpu.memory_space<vmem>>, vector<8x256xf32>,
    return
  }
  func.func @transform_0(%arg0: i32) -> (i32, i32) {
    %c0_i32 = arith.constant 0 : i32
    %c0_i32_0 = arith.constant 0 : i32
    return %arg0, %c0_i32 : i32, i32
  }
  func.func @transform_1(%arg0: i32) -> (i32, i32) {
    %c0_i32 = arith.constant 0 : i32
    %c0_i32_0 = arith.constant 0 : i32
    return %arg0, %c0_i32 : i32, i32
  }
  func.func @transform_2(%arg0: i32) -> (i32, i32) {
    %c0_i32 = arith.constant 0 : i32
    %c0_i32_0 = arith.constant 0 : i32
    return %arg0, %c0_i32 : i32, i32
  }
}

</mosaic_0001>

<bundles_post_ra>
// kernel: tile.0
= control target key start
LH: loop header
LB: loop body
LE: loop exit
PB: predicated region body
PF: predicated region fallthrough
CT: control target
= control target key end

     0   :  { %s34_s8 = smov 125   ;;  %vm7_vm0 = vcmask 7168   ;;  %s35_s11 = smov 126   ;;  %s61_s0 = inlined_call_operand.vmem [shape: f32[2,4], index: 0, kind: input, shape index: {}]   ;;  %s62_s1 = inlined_call_operand.vmem [shape: f32[8,1], index: 1, kind: output, shape index: {}]  }
   0x1   :  { %v4_v0 = vld [vmem:[%s61_s0] sm:$0x3]  ;;  %s33_s0 = smov 127  }
   0x2   :  { %5 = vst [vmem:[#allocation0] sm:$0x3] %v4_v0 }
   0x9   :  { %v9_v1 = vld [vmem:[#allocation0] sm:$0x3]  }
   0xa   :  { %v21_v2 = vld [vmem:[#allocation0] sm:$0x3]   ;;  %10 = vrot.lane.b32.xlu0 %v9_v1, %s33_s0 }
   0xb   :  { %22 = vrot.lane.b32.xlu1 %v21_v2, %s34_s8  ;;  %v6_v3 = vld [vmem:[#allocation0] sm:$0x3]  }
   0xc   :  { %v15_v4 = vld [vmem:[#allocation0] sm:$0x3]   ;;  %8 = vst.msk [vmem:[%s62_s1] ss:$4 sm:$0x3] %vm7_vm0, %v6_v3  }
   0xe   :  { %16 = vrot.lane.b32.xlu0 %v15_v4, %s35_s11 }
  0x7c   :  { %v11_v5 = vpop.permute.xlu0 %10  }
  0x7d   :  { %v23_v6 = vpop.permute.xlu1 %22   ;;  %27 = vst.msk [vmem:[%s62_s1 + $0x1] ss:$4 sm:$0x3] %vm7_vm0, %v11_v5  }
  0x7e   :  { %29 = vst.msk [vmem:[%s62_s1 + $0x3] ss:$4 sm:$0x3] %vm7_vm0, %v23_v6  }
  0x80   :  { %v17_v7 = vpop.permute.xlu0 %16  }
  0x81   :  { %28 = vst.msk [vmem:[%s62_s1 + $0x2] ss:$4 sm:$0x3] %vm7_vm0, %v17_v7  }

// kernel: tile.8
= control target key start
LH: loop header
LB: loop body
LE: loop exit
PB: predicated region body
PF: predicated region fallthrough
CT: control target
= control target key end

     0   :  { %s22_s0 = inlined_call_operand.vmem [shape: f32[4], index: 0, kind: input, shape index: {}]   ;;  %s23_s1 = inlined_call_operand.vmem [shape: f32[2,4], index: 1, kind: output, shape index: {}]  }
   0x1   :  { %v4_v0 = vld [vmem:[%s22_s0] ss:$0 sm:$0xff] }
   0x2   :  { %5 = vst [vmem:[%s23_s1] sm:$0x3] %v4_v0 }

// kernel: insnorm.1
= control target key start
LH: loop header
LB: loop body
LE: loop exit
PB: predicated region body
PF: predicated region fallthrough
CT: control target
= control target key end

     0   :  { %v55_v10 = vmov 0   ;;  %s86_s0 = inlined_call_operand.vmem [shape: f32[8,256], index: 0, kind: input, shape index: {}]   ;;  %s87_s1 = inlined_call_operand.vmem [shape: f32[8,1], index: 1, kind: input, shape index: {}]   ;;  %s88_s2 = inlined_call_operand.vmem [shape: f32[8,256], index: 2, kind: output, shape index: {}]  }
   0x1   :  { %v11_v0 = vld [vmem:[%s86_s0] sm:$0xff]  ;;  %v12_v1 = vld [vmem:[%s86_s0 + $0x8] sm:$0xff]  ;;  %51 = vset.pattern.permute.xlu1 %v55_v10  ;;  %52 = vset.pattern.permute.xlu0 %v55_v10 }
   0x2   :  { %v14_v2 = vadd.f32 %v12_v1, %v11_v0  ;;  %v13_v14 = vld [vmem:[%s87_s1] sm:$0xff] }
   0x4   :  { %15 = vadd.xlane.f32.xlu0 %v14_v2 }
  0x91   :  { %v16_v3 = vpop.xlane.xlu0 %15 }
  0x92   :  { %v18_v4 = vmul.f32 0.00390625, %v16_v3 }
  0x94   :  { %v19_v5 = vsub.f32 %v11_v0, %v18_v4  ;;  %v20_v6 = vsub.f32 %v12_v1, %v18_v4 }
  0x96   :  { %v21_v7 = vmul.f32 %v19_v5, %v19_v5  ;;  %v22_v8 = vmul.f32 %v20_v6, %v20_v6 }
  0x98   :  { %v23_v9 = vadd.f32 %v22_v8, %v21_v7 }
  0x9a   :  { %24 = vadd.xlane.f32.xlu0 %v23_v9 }
 0x127   :  { %v25_v11 = vpop.xlane.xlu0 %24 }
 0x128   :  { %v26_v12 = vmul.f32 0.00390625, %v25_v11 }
 0x12a   :  { %v27_v13 = vadd.f32 1e-09, %v26_v12 }
 0x12c   :  { %53 = vrsqrt.f32 %v27_v13 }
 0x136   :  { %v54_v15 = vpop.eup %53 }
 0x137   :  { %v29_v16 = vmul.f32 %v54_v15, %v13_v14 }
 0x139   :  { %32 = vperm.xlu1 %51, %v29_v16  }
 0x13d   :  { %39 = vperm.xlu1 %51, %v13_v14  }
 0x1b8   :  { %v33_v17 = vpop.permute.xlu1 %32 }
 0x1b9   :  { %v35_v18 = vmul.f32 %v33_v17, %v19_v5  ;;  %v36_v19 = vmul.f32 %v33_v17, %v20_v6 }
 0x1bc   :  { %v40_v20 = vpop.permute.xlu1 %39 }
 0x1bd   :  { %v42_v21 = vadd.f32 %v40_v20, %v35_v18  ;;  %v43_v22 = vadd.f32 %v40_v20, %v36_v19 }
 0x1bf   :  { %44 = vst [vmem:[%s88_s2] sm:$0xff] %v42_v21  ;;  %45 = vst [vmem:[%s88_s2 + $0x8] sm:$0xff] %v43_v22 }

</bundles_post_ra>
